<compile_context>
chip_gen: v7x
topology: tpu7x:2x2x1
jax: 0.10.0
libtpu: 0.0.40
codegen_flags: <defaults>
</compile_context>

<pallas_src>
import math

import jax
import jax.numpy as jnp
from jax import lax
from jax.experimental import pallas as pl
from jax.experimental.pallas import tpu as pltpu


# ----------------------------- helpers -----------------------------
def _round_up(x, m):
    return ((x + m - 1) // m) * m


def _vmem_capacity_bytes():
    try:
        info = pltpu.get_tpu_info()
        cap = getattr(info, "vmem_capacity_bytes", None)
        if cap:
            return int(cap)
    except Exception:
        pass
    return 128 * 1024 * 1024  # assume v5e/v6e-class if unknown


# ----------------------------- Param prep (hoisted, one-time) -----------------------------
def prepare_params(w, b, gamma=None, beta=None, *, param_dtype=None):
    """Done ONCE at parameter-load time.

    w: (D_out, D_in) torch Linear layout -> stored as (D_in, D_out), optionally
    cast (e.g. to bf16 for the native MXU feed on v6e/v7x).
    bias / gamma / beta are tiny and kept in f32 (LN math is f32 anyway).
    """
    w = jnp.asarray(w)
    if param_dtype is not None:
        w = w.astype(param_dtype)
    prep = {
        "w_t": jnp.asarray(w.T),                                # (D_in, D_out)
        "b": jnp.asarray(b, jnp.float32).reshape(1, -1),        # (1, D_out)
    }
    if gamma is not None:
        prep["gamma"] = jnp.asarray(gamma, jnp.float32).reshape(1, -1)
        prep["beta"] = jnp.asarray(beta, jnp.float32).reshape(1, -1)
    return prep


# ----------------------------- Fused kernel -----------------------------
def _make_add_ln_kernel(eps, has_residual, with_ln):
    """Kernel factory; `has_residual` / `with_ln` are static Python flags that
    decide which refs exist (no dead inputs are DMA'd)."""

    def kernel(*refs):
        idx = 0
        x_ref = refs[idx]; idx += 1          # (T, D_in)   native dtype
        w_ref = refs[idx]; idx += 1          # (D_in, D_out) pre-transposed
        b_ref = refs[idx]; idx += 1          # (1, D_out)  f32
        res_ref = None
        if has_residual:
            res_ref = refs[idx]; idx += 1    # (T, D_out)  native dtype
        g_ref = be_ref = None
        if with_ln:
            g_ref = refs[idx]; idx += 1      # (1, D_out)  f32
            be_ref = refs[idx]; idx += 1     # (1, D_out)  f32
        o_ref = refs[idx]                    # (T, D_out)  native dtype

        # Linear: contracting dims are last-of-x / first-of-w -> direct MXU feed,
        # f32 accumulation regardless of input dtype.
        y = jnp.dot(x_ref[...], w_ref[...],
                    preferred_element_type=jnp.float32) + b_ref[...]

        # Dropout (eval mode): identity.

        if has_residual:
            y = y + res_ref[...].astype(jnp.float32)

        if with_ln:
            # PyTorch LayerNorm: biased variance over last dim, eps inside rsqrt.
            mean = jnp.mean(y, axis=-1, keepdims=True)
            c = y - mean
            var = jnp.mean(c * c, axis=-1, keepdims=True)
            inv = lax.rsqrt(var + jnp.float32(eps))
            y = c * inv * g_ref[...] + be_ref[...]

        # dropout_last (eval mode): identity.
        o_ref[...] = y.astype(o_ref.dtype)

    return kernel


# ----------------------------- Wrapper -----------------------------
def add_and_ln_forward(prep, hidden_states, input_tensor=None, *,
                       eps=1e-12, with_ln=True, dropout_last=False,
                       row_tile=None):
    """Mirrors Add_and_LN.forward in eval mode.

    prep: output of prepare_params().
    hidden_states: (..., D_in);  input_tensor: (..., D_out) or None.
    Output dtype == hidden_states.dtype.
    """
    del dropout_last  # eval mode: dropout is identity either way

    x = hidden_states
    lead_shape = x.shape[:-1]
    d_in = x.shape[-1]
    w_t = prep["w_t"]
    d_out = w_t.shape[1]
    n = int(math.prod(lead_shape)) if lead_shape else 1
    out_dtype = x.dtype

    x2d = x.reshape(n, d_in)                               # native dtype, no cast
    has_residual = input_tensor is not None
    res2d = input_tensor.reshape(n, d_out) if has_residual else None

    # ---- generation-aware tile sizing ----
    vmem_cap = _vmem_capacity_bytes()
    small_vmem = vmem_cap <= 64 * 1024 * 1024              # v7x-class (64 MiB/TC)
    vmem_limit = (48 if small_vmem else 64) * 1024 * 1024
    max_tile = 512 if small_vmem else 1024
    if row_tile is not None:
        max_tile = int(row_tile)

    bw = jnp.dtype(w_t.dtype).itemsize
    bx = jnp.dtype(x2d.dtype).itemsize
    br = jnp.dtype(res2d.dtype).itemsize if has_residual else 0
    bo = jnp.dtype(out_dtype).itemsize
    # Resident constants (worst case: weight double-buffered) + small vectors.
    const_bytes = 2 * d_in * d_out * bw + 6 * 4 * d_out
    # Double-buffered row tiles + rough f32 intermediates.
    per_row = 2 * (d_in * bx + d_out * (br + bo)) + 8 * d_out
    budget = int(0.75 * vmem_limit)
    cap = max((budget - const_bytes) // max(per_row, 1), 8)
    tile_hi = max(8, (int(min(max_tile, cap)) // 8) * 8)

    if n <= tile_hi:
        # Split small-but-not-tiny n into >=2 grid steps so both v7x TCs work.
        tile = _round_up(pl.cdiv(n, 2), 8) if n >= 16 else n
    else:
        tile = tile_hi
    grid = (pl.cdiv(n, tile),)

    # ---- inputs ----
    in_arrays = [x2d, w_t, prep["b"]]
    if has_residual:
        in_arrays.append(res2d)
    if with_ln:
        in_arrays += [prep["gamma"], prep["beta"]]

    def _const_spec(shape, single_buffer):
        idx_map = lambda i: (0,) * len(shape)
        if single_buffer and hasattr(pl, "Buffered"):
            return pl.BlockSpec(shape, idx_map, pipeline_mode=pl.Buffered(1))
        return pl.BlockSpec(shape, idx_map)

    def _build_specs(single_buffer):
        specs = [
            pl.BlockSpec((tile, d_in), lambda i: (i, 0)),
            _const_spec((d_in, d_out), single_buffer),
            _const_spec((1, d_out), single_buffer),
        ]
        if has_residual:
            specs.append(pl.BlockSpec((tile, d_out), lambda i: (i, 0)))
        if with_ln:
            specs += [_const_spec((1, d_out), single_buffer),
                      _const_spec((1, d_out), single_buffer)]
        return specs

    # ---- advisory cost estimate ----
    flops = 2 * n * d_in * d_out + n * d_out * (6 if with_ln else 2)
    transc = n if with_ln else 0
    bytes_accessed = (n * d_in * bx + d_in * d_out * bw + 4 * d_out
                      + (n * d_out * br if has_residual else 0)
                      + (8 * d_out if with_ln else 0)
                      + n * d_out * bo)
    cost = pl.CostEstimate(flops=int(flops), transcendentals=int(transc),
                           bytes_accessed=int(bytes_accessed))

    def _call(single_buffer):
        return pl.pallas_call(
            _make_add_ln_kernel(eps, has_residual, with_ln),
            out_shape=jax.ShapeDtypeStruct((n, d_out), out_dtype),
            grid_spec=pltpu.PrefetchScalarGridSpec(
                num_scalar_prefetch=0,
                grid=grid,
                in_specs=_build_specs(single_buffer),
                out_specs=pl.BlockSpec((tile, d_out), lambda i: (i, 0)),
            ),
            compiler_params=pltpu.CompilerParams(
                dimension_semantics=("parallel",),
                vmem_limit_bytes=vmem_limit),
            cost_estimate=cost,
        )(*in_arrays)

    try:
        out = _call(True)
    except Exception:
        # Fallback if this jax build rejects pipeline_mode=pl.Buffered(1).
        out = _call(False)

    return out.reshape(*lead_shape, d_out)


# ----------------------------- Plain-JAX reference -----------------------------
def add_and_ln_reference(params, hidden_states, input_tensor=None, *,
                         eps=1e-12, with_ln=True):
    y = hidden_states.astype(jnp.float32) @ params["w"].T + params["b"]
    if input_tensor is not None:
        y = y + input_tensor.astype(jnp.float32)
    if with_ln:
        mean = jnp.mean(y, axis=-1, keepdims=True)
        var = jnp.mean((y - mean) ** 2, axis=-1, keepdims=True)
        y = (y - mean) / jnp.sqrt(var + eps) * params["gamma"] + params["beta"]
    return y


if __name__ == "__main__":
    # Shapes consistent with the Decoder config: batch=2, seq=8,
    # input_dim=32, module_dim=32, LN_eps=1e-12, dropout=0.5 (eval -> identity).
    B, L, D_IN, D_OUT = 2, 8, 32, 32
    EPS = 1e-12

    key = jax.random.PRNGKey(0)
    kw, kb, kg, kbeta, kx, kres = jax.random.split(key, 6)
    bound = 1.0 / math.sqrt(D_IN)
    params = {
        "w": jax.random.uniform(kw, (D_OUT, D_IN), jnp.float32, -bound, bound),
        "b": jax.random.uniform(kb, (D_OUT,), jnp.float32, -bound, bound),
        "gamma": 1.0 + 0.1 * jax.random.normal(kg, (D_OUT,), jnp.float32),
        "beta": 0.1 * jax.random.normal(kbeta, (D_OUT,), jnp.float32),
    }
    # One-time hoisted param prep (transpose + optional cast).
    prep_f32 = prepare_params(params["w"], params["b"], params["gamma"], params["beta"])
    prep_bf16 = prepare_params(params["w"], params["b"], params["gamma"], params["beta"],
                               param_dtype=jnp.bfloat16)

    hidden_states = jax.random.normal(kx, (B, L, D_IN), jnp.float32)
    input_tensor = jax.random.normal(kres, (B, L, D_OUT), jnp.float32)

    # Case 1: with residual + LayerNorm (the main path).
    out1 = add_and_ln_forward(prep_f32, hidden_states, input_tensor, eps=EPS, with_ln=True)
    out1 = jax.block_until_ready(out1)
    ref1 = add_and_ln_reference(params, hidden_states, input_tensor, eps=EPS, with_ln=True)
    assert out1.dtype == hidden_states.dtype
    assert jnp.allclose(out1, ref1, rtol=1e-4, atol=1e-4)

    # Case 2: no residual, with LayerNorm.
    out2 = add_and_ln_forward(prep_f32, hidden_states, None, eps=EPS, with_ln=True)
    out2 = jax.block_until_ready(out2)
    ref2 = add_and_ln_reference(params, hidden_states, None, eps=EPS, with_ln=True)
    assert jnp.allclose(out2, ref2, rtol=1e-4, atol=1e-4)

    # Case 3: with residual, LayerNorm disabled (with_lN=False).
    out3 = add_and_ln_forward(prep_f32, hidden_states, input_tensor, eps=EPS, with_ln=False)
    out3 = jax.block_until_ready(out3)
    ref3 = add_and_ln_reference(params, hidden_states, input_tensor, eps=EPS, with_ln=False)
    assert jnp.allclose(out3, ref3, rtol=1e-4, atol=1e-4)

    # Case 4: native bf16 I/O path (no wrapper-side f32 casts); output stays bf16.
    out4 = add_and_ln_forward(prep_bf16, hidden_states.astype(jnp.bfloat16),
                              input_tensor.astype(jnp.bfloat16), eps=EPS, with_ln=True)
    out4 = jax.block_until_ready(out4)
    assert out4.dtype == jnp.bfloat16
    assert jnp.allclose(out4.astype(jnp.float32), ref1, rtol=1e-1, atol=1e-1)

    print("KERNEL_OK")
</pallas_src>

<mosaic_0001>
module attributes {stable_mosaic.version = 11 : i64} {
  func.func @kernel(%arg0: i32, %arg1: memref<8x32xf32, #tpu.memory_space<vmem>>, %arg2: memref<32x32xf32, #tpu.memory_space<vmem>>, %arg3: memref<1x32xf32, #tpu.memory_space<vmem>>, %arg4: memref<8x32xf32, #tpu.memory_space<vmem>>, %arg5: memref<1x32xf32, #tpu.memory_space<vmem>>, %arg6: memref<1x32xf32, #tpu.memory_space<vmem>>, %arg7: memref<8x32xf32, #tpu.memory_space<vmem>>) attributes {dimension_semantics = [#tpu.dimension_semantics<parallel>], iteration_bounds = array<i64: 2>, scalar_prefetch = 0 : i64, scratch_operands = 0 : i64, tpu.core_type = #tpu.core_type<tc>, window_params = [{transform_indices = @transform_0, window_bounds = array<i64: 8, 32>}, {pipeline_mode = #tpu.pipeline_mode<synchronous>, transform_indices = @transform_1, window_bounds = array<i64: 32, 32>}, {pipeline_mode = #tpu.pipeline_mode<synchronous>, transform_indices = @transform_2, window_bounds = array<i64: 1, 32>}, {transform_indices = @transform_3, window_bounds = array<i64: 8, 32>}, {pipeline_mode = #tpu.pipeline_mode<synchronous>, transform_indices = @transform_4, window_bounds = array<i64: 1, 32>}, {pipeline_mode = #tpu.pipeline_mode<synchronous>, transform_indices = @transform_5, window_bounds = array<i64: 1, 32>}, {transform_indices = @transform_6, window_bounds = array<i64: 8, 32>}]} {
    %c0 = arith.constant 0 : index
    %c0_0 = arith.constant 0 : index
    %0 = vector.load %arg1[%c0, %c0_0] : memref<8x32xf32, #tpu.memory_space<vmem>>, vector<8x32xf32>
    %c0_1 = arith.constant 0 : index
    %c0_2 = arith.constant 0 : index
    %1 = vector.load %arg2[%c0_1, %c0_2] : memref<32x32xf32, #tpu.memory_space<vmem>>, vector<32x32xf32>
    %cst = arith.constant dense<0.000000e+00> : vector<8x32xf32>
    %2 = tpu.matmul %0, %1, %cst {dimension_numbers = #tpu.dot_dimension_numbers<[1], [0], [0], [1], [0, 0, 1, 1], [], []>} : vector<8x32xf32>, vector<32x32xf32>, vector<8x32xf32> -> vector<8x32xf32>
    %c0_3 = arith.constant 0 : index
    %c0_4 = arith.constant 0 : index
    %3 = vector.load %arg3[%c0_3, %c0_4] : memref<1x32xf32, #tpu.memory_space<vmem>>, vector<1x32xf32>
    %4 = vector.broadcast %3 : vector<1x32xf32> to vector<8x32xf32>
    %5 = arith.addf %2, %4 : vector<8x32xf32>
    %c0_5 = arith.constant 0 : index
    %c0_6 = arith.constant 0 : index
    %6 = vector.load %arg4[%c0_5, %c0_6] : memref<8x32xf32, #tpu.memory_space<vmem>>, vector<8x32xf32>
    %7 = arith.addf %5, %6 : vector<8x32xf32>
    %cst_7 = arith.constant dense<0.000000e+00> : vector<8xf32>
    %8 = vector.multi_reduction <add>, %7, %cst_7 [1] : vector<8x32xf32> to vector<8xf32>
    %9 = vector.shape_cast %8 : vector<8xf32> to vector<8x1xf32>
    %cst_8 = arith.constant 3.200000e+01 : f32
    %10 = vector.broadcast %cst_8 : f32 to vector<8x1xf32>
    %11 = arith.divf %9, %10 : vector<8x1xf32>
    %12 = vector.broadcast %11 : vector<8x1xf32> to vector<8x32xf32>
    %13 = arith.subf %7, %12 : vector<8x32xf32>
    %14 = arith.mulf %13, %13 : vector<8x32xf32>
    %cst_9 = arith.constant dense<0.000000e+00> : vector<8xf32>
    %15 = vector.multi_reduction <add>, %14, %cst_9 [1] : vector<8x32xf32> to vector<8xf32>
    %16 = vector.shape_cast %15 : vector<8xf32> to vector<8x1xf32>
    %cst_10 = arith.constant 3.200000e+01 : f32
    %17 = vector.broadcast %cst_10 : f32 to vector<8x1xf32>
    %18 = arith.divf %16, %17 : vector<8x1xf32>
    %cst_11 = arith.constant 9.99999996E-13 : f32
    %19 = vector.broadcast %cst_11 : f32 to vector<8x1xf32>
    %20 = arith.addf %18, %19 : vector<8x1xf32>
    %21 = math.rsqrt %20 : vector<8x1xf32>
    %22 = vector.broadcast %21 : vector<8x1xf32> to vector<8x32xf32>
    %23 = arith.mulf %13, %22 : vector<8x32xf32>
    %c0_12 = arith.constant 0 : index
    %c0_13 = arith.constant 0 : index
    %24 = vector.load %arg5[%c0_12, %c0_13] : memref<1x32xf32, #tpu.memory_space<vmem>>, vector<1x32xf32>
    %25 = vector.broadcast %24 : vector<1x32xf32> to vector<8x32xf32>
    %26 = arith.mulf %23, %25 : vector<8x32xf32>
    %c0_14 = arith.constant 0 : index
    %c0_15 = arith.constant 0 : index
    %27 = vector.load %arg6[%c0_14, %c0_15] : memref<1x32xf32, #tpu.memory_space<vmem>>, vector<1x32xf32>
    %28 = vector.broadcast %27 : vector<1x32xf32> to vector<8x32xf32>
    %29 = arith.addf %26, %28 : vector<8x32xf32>
    %c0_16 = arith.constant 0 : index
    %c0_17 = arith.constant 0 : index
    %30 = vector.load %arg7[%c0_16, %c0_17] : memref<8x32xf32, #tpu.memory_space<vmem>>, vector<8x32xf32>
    tpu.vector_store %arg7[%c0_16, %c0_17], %29 {strides = array<i32>} : memref<8x32xf32, #tpu.memory_space<vmem>>, vector<8x32xf32>,
    return
  }
  func.func @transform_0(%arg0: i32) -> (i32, i32) {
    %c0_i32 = arith.constant 0 : i32
    %c0_i32_0 = arith.constant 0 : i32
    return %arg0, %c0_i32 : i32, i32
  }
  func.func @transform_1(%arg0: i32) -> (i32, i32) {
    %c0_i32 = arith.constant 0 : i32
    %c0_i32_0 = arith.constant 0 : i32
    %c0_i32_1 = arith.constant 0 : i32
    return %c0_i32, %c0_i32_0 : i32, i32
  }
  func.func @transform_2(%arg0: i32) -> (i32, i32) {
    %c0_i32 = arith.constant 0 : i32
    %c0_i32_0 = arith.constant 0 : i32
    %c0_i32_1 = arith.constant 0 : i32
    return %c0_i32, %c0_i32_0 : i32, i32
  }
  func.func @transform_3(%arg0: i32) -> (i32, i32) {
    %c0_i32 = arith.constant 0 : i32
    %c0_i32_0 = arith.constant 0 : i32
    return %arg0, %c0_i32 : i32, i32
  }
  func.func @transform_4(%arg0: i32) -> (i32, i32) {
    %c0_i32 = arith.constant 0 : i32
    %c0_i32_0 = arith.constant 0 : i32
    %c0_i32_1 = arith.constant 0 : i32
    return %c0_i32, %c0_i32_0 : i32, i32
  }
  func.func @transform_5(%arg0: i32) -> (i32, i32) {
    %c0_i32 = arith.constant 0 : i32
    %c0_i32_0 = arith.constant 0 : i32
    %c0_i32_1 = arith.constant 0 : i32
    return %c0_i32, %c0_i32_0 : i32, i32
  }
  func.func @transform_6(%arg0: i32) -> (i32, i32) {
    %c0_i32 = arith.constant 0 : i32
    %c0_i32_0 = arith.constant 0 : i32
    return %arg0, %c0_i32 : i32, i32
  }
}

module attributes {stable_mosaic.version = 11 : i64} {
  func.func @kernel(%arg0: i32, %arg1: memref<8x32xf32, #tpu.memory_space<vmem>>, %arg2: memref<32x32xf32, #tpu.memory_space<vmem>>, %arg3: memref<1x32xf32, #tpu.memory_space<vmem>>, %arg4: memref<8x32xf32, #tpu.memory_space<vmem>>, %arg5: memref<1x32xf32, #tpu.memory_space<vmem>>, %arg6: memref<1x32xf32, #tpu.memory_space<vmem>>, %arg7: memref<8x32xf32, #tpu.memory_space<vmem>>) attributes {dimension_semantics = [#tpu.dimension_semantics<parallel>], iteration_bounds = array<i64: 2>, scalar_prefetch = 0 : i64, scratch_operands = 0 : i64, tpu.core_type = #tpu.core_type<tc>, window_params = [{transform_indices = @transform_0, window_bounds = array<i64: 8, 32>}, {pipeline_mode = #tpu.pipeline_mode<synchronous>, transform_indices = @transform_1, window_bounds = array<i64: 32, 32>}, {pipeline_mode = #tpu.pipeline_mode<synchronous>, transform_indices = @transform_2, window_bounds = array<i64: 1, 32>}, {transform_indices = @transform_3, window_bounds = array<i64: 8, 32>}, {pipeline_mode = #tpu.pipeline_mode<synchronous>, transform_indices = @transform_4, window_bounds = array<i64: 1, 32>}, {pipeline_mode = #tpu.pipeline_mode<synchronous>, transform_indices = @transform_5, window_bounds = array<i64: 1, 32>}, {transform_indices = @transform_6, window_bounds = array<i64: 8, 32>}]} {
    %c0 = arith.constant 0 : index
    %c0_0 = arith.constant 0 : index
    %0 = vector.load %arg1[%c0, %c0_0] : memref<8x32xf32, #tpu.memory_space<vmem>>, vector<8x32xf32>
    %c0_1 = arith.constant 0 : index
    %c0_2 = arith.constant 0 : index
    %1 = vector.load %arg2[%c0_1, %c0_2] : memref<32x32xf32, #tpu.memory_space<vmem>>, vector<32x32xf32>
    %cst = arith.constant dense<0.000000e+00> : vector<8x32xf32>
    %2 = tpu.matmul %0, %1, %cst {dimension_numbers = #tpu.dot_dimension_numbers<[1], [0], [0], [1], [0, 0, 1, 1], [], []>} : vector<8x32xf32>, vector<32x32xf32>, vector<8x32xf32> -> vector<8x32xf32>
    %c0_3 = arith.constant 0 : index
    %c0_4 = arith.constant 0 : index
    %3 = vector.load %arg3[%c0_3, %c0_4] : memref<1x32xf32, #tpu.memory_space<vmem>>, vector<1x32xf32>
    %4 = vector.broadcast %3 : vector<1x32xf32> to vector<8x32xf32>
    %5 = arith.addf %2, %4 : vector<8x32xf32>
    %c0_5 = arith.constant 0 : index
    %c0_6 = arith.constant 0 : index
    %6 = vector.load %arg4[%c0_5, %c0_6] : memref<8x32xf32, #tpu.memory_space<vmem>>, vector<8x32xf32>
    %7 = arith.addf %5, %6 : vector<8x32xf32>
    %cst_7 = arith.constant dense<0.000000e+00> : vector<8xf32>
    %8 = vector.multi_reduction <add>, %7, %cst_7 [1] : vector<8x32xf32> to vector<8xf32>
    %9 = vector.shape_cast %8 : vector<8xf32> to vector<8x1xf32>
    %cst_8 = arith.constant 3.200000e+01 : f32
    %10 = vector.broadcast %cst_8 : f32 to vector<8x1xf32>
    %11 = arith.divf %9, %10 : vector<8x1xf32>
    %12 = vector.broadcast %11 : vector<8x1xf32> to vector<8x32xf32>
    %13 = arith.subf %7, %12 : vector<8x32xf32>
    %14 = arith.mulf %13, %13 : vector<8x32xf32>
    %cst_9 = arith.constant dense<0.000000e+00> : vector<8xf32>
    %15 = vector.multi_reduction <add>, %14, %cst_9 [1] : vector<8x32xf32> to vector<8xf32>
    %16 = vector.shape_cast %15 : vector<8xf32> to vector<8x1xf32>
    %cst_10 = arith.constant 3.200000e+01 : f32
    %17 = vector.broadcast %cst_10 : f32 to vector<8x1xf32>
    %18 = arith.divf %16, %17 : vector<8x1xf32>
    %cst_11 = arith.constant 9.99999996E-13 : f32
    %19 = vector.broadcast %cst_11 : f32 to vector<8x1xf32>
    %20 = arith.addf %18, %19 : vector<8x1xf32>
    %21 = math.rsqrt %20 : vector<8x1xf32>
    %22 = vector.broadcast %21 : vector<8x1xf32> to vector<8x32xf32>
    %23 = arith.mulf %13, %22 : vector<8x32xf32>
    %c0_12 = arith.constant 0 : index
    %c0_13 = arith.constant 0 : index
    %24 = vector.load %arg5[%c0_12, %c0_13] : memref<1x32xf32, #tpu.memory_space<vmem>>, vector<1x32xf32>
    %25 = vector.broadcast %24 : vector<1x32xf32> to vector<8x32xf32>
    %26 = arith.mulf %23, %25 : vector<8x32xf32>
    %c0_14 = arith.constant 0 : index
    %c0_15 = arith.constant 0 : index
    %27 = vector.load %arg6[%c0_14, %c0_15] : memref<1x32xf32, #tpu.memory_space<vmem>>, vector<1x32xf32>
    %28 = vector.broadcast %27 : vector<1x32xf32> to vector<8x32xf32>
    %29 = arith.addf %26, %28 : vector<8x32xf32>
    %c0_16 = arith.constant 0 : index
    %c0_17 = arith.constant 0 : index
    %30 = vector.load %arg7[%c0_16, %c0_17] : memref<8x32xf32, #tpu.memory_space<vmem>>, vector<8x32xf32>
    tpu.vector_store %arg7[%c0_16, %c0_17], %29 {strides = array<i32>} : memref<8x32xf32, #tpu.memory_space<vmem>>, vector<8x32xf32>,
    return
  }
  func.func @transform_0(%arg0: i32) -> (i32, i32) {
    %c0_i32 = arith.constant 0 : i32
    %c0_i32_0 = arith.constant 0 : i32
    return %arg0, %c0_i32 : i32, i32
  }
  func.func @transform_1(%arg0: i32) -> (i32, i32) {
    %c0_i32 = arith.constant 0 : i32
    %c0_i32_0 = arith.constant 0 : i32
    %c0_i32_1 = arith.constant 0 : i32
    return %c0_i32, %c0_i32_0 : i32, i32
  }
  func.func @transform_2(%arg0: i32) -> (i32, i32) {
    %c0_i32 = arith.constant 0 : i32
    %c0_i32_0 = arith.constant 0 : i32
    %c0_i32_1 = arith.constant 0 : i32
    return %c0_i32, %c0_i32_0 : i32, i32
  }
  func.func @transform_3(%arg0: i32) -> (i32, i32) {
    %c0_i32 = arith.constant 0 : i32
    %c0_i32_0 = arith.constant 0 : i32
    return %arg0, %c0_i32 : i32, i32
  }
  func.func @transform_4(%arg0: i32) -> (i32, i32) {
    %c0_i32 = arith.constant 0 : i32
    %c0_i32_0 = arith.constant 0 : i32
    %c0_i32_1 = arith.constant 0 : i32
    return %c0_i32, %c0_i32_0 : i32, i32
  }
  func.func @transform_5(%arg0: i32) -> (i32, i32) {
    %c0_i32 = arith.constant 0 : i32
    %c0_i32_0 = arith.constant 0 : i32
    %c0_i32_1 = arith.constant 0 : i32
    return %c0_i32, %c0_i32_0 : i32, i32
  }
  func.func @transform_6(%arg0: i32) -> (i32, i32) {
    %c0_i32 = arith.constant 0 : i32
    %c0_i32_0 = arith.constant 0 : i32
    return %arg0, %c0_i32 : i32, i32
  }
}

</mosaic_0001>

<bundles_post_ra>
// kernel: tpu_custom_call.1
= control target key start
LH: loop header
LB: loop body
LE: loop exit
PB: predicated region body
PF: predicated region fallthrough
CT: control target
= control target key end

     0   :  { %s1402_s0 = inlined_call_operand.hbm [shape: f32[16,32], index: 0, kind: input, shape index: {}]   ;;  %s1403_s1 = inlined_call_operand.hbm [shape: f32[32,32], index: 1, kind: input, shape index: {}]   ;;  %s1404_s2 = inlined_call_operand.hbm [shape: f32[1,32], index: 2, kind: input, shape index: {}]   ;;  %s1405_s3 = inlined_call_operand.hbm [shape: f32[16,32], index: 3, kind: input, shape index: {}]   ;;  %s1406_s4 = inlined_call_operand.hbm [shape: f32[1,32], index: 4, kind: input, shape index: {}]   ;;  %s1407_s5 = inlined_call_operand.hbm [shape: f32[1,32], index: 5, kind: input, shape index: {}]   ;;  %s1408_s6 = inlined_call_operand.hbm [shape: f32[16,32], index: 6, kind: output, shape index: {}]  }
   0x1   :  { %1413 = sst [smem:[#allocation20_spill]] %s1403_s1 }
   0x2   :  { %1414 = sst [smem:[#allocation21_spill]] %s1404_s2 }
   0x3   :  { %1415 = sst [smem:[#allocation22_spill]] %s1406_s4 }
   0x4   :  { %11 = vsyncpa [#allocation3], 0 }
   0x5   :  { %13 = vsyncpa [#allocation3 + $0x1], 0 }
   0x6   :  { %14 = vsyncpa [#allocation6], 0 }
   0x7   :  { %15 = vsyncpa [#allocation9], 0 }
   0x8   :  { %17 = vsyncpa [#allocation9 + $0x1], 0 }
   0x9   :  { %18 = vsyncpa [#allocation12], 0 }
   0xa   :  { %19 = vsyncpa [#allocation4], 0 }
   0xb   :  { %21 = vsyncpa [#allocation4 + $0x1], 0  ;;  %s1071_s21 = smov 0   ;;  %s1073_s22 = smov 0  }
   0xc   :  { %s1075_s23 = smov 0   ;;  %s1077_s24 = smov 0  }
   0xd LB: > { %s1024_s25 = smov [#allocation5]   ;;  %s1092_s27 = sadd.s32 4294967295, %s1022_s24   ;;  %s1022_s24 = sphi %s1077_s24, %s1442_s24   ;;  %s1018_s23 = sphi %s1075_s23, %s1441_s23   ;;  %s1014_s22 = sphi %s1073_s22, %s1440_s22   ;;  %s1010_s21 = sphi %s1071_s21, %s1439_s21  }
   0xe   : > { %s206_s26 = sshll.u32 %s1024_s25, 4  ;;  %p621_p0 = scmp.ge.s32.totalorder %s1022_s24, 1  ;;  %s1097_s26 = int_to_ptr.vmem [resolvable:$true] %s206_s26 }
   0xf   : > { %p1409_p1 = scmp.eq.s32.totalorder %s1092_s27, 0  ;;  %p194_p2 = scmp.lt.s32.totalorder %s1022_s24, 3 }
  0x10   : > { %s1025_s29 = smov [#allocation10]   ;;  %s1026_s8 = smov [#allocation7]  }
  0x11   : > { %p1099_p3 = pnand %p621_p0, %p194_p2  ;;  %s231_s30 = sshll.u32 %s1025_s29, 4  ;;  %s1112_s30 = int_to_ptr.vmem [resolvable:$true] %s231_s30 }
  0x12   : > { %s220_s9 = sshll.u32 %s1026_s8, 4  ;;  %s1418_s1 = sld [smem:[#allocation20_spill]]  ;;  %s1114_s9 = int_to_ptr.vmem [resolvable:$true] %s220_s9 }
  0x13   : > { %s1416_s28 = scalar_select %p1099_p3, 1, 0 }
  0x14   : > { %p691_p5 = pneg %p1099_p3 }
  0x16   : > { %p1108_p6 = pnand %p691_p5, %p1409_p1 }
  0x18   : > { %s768_s12 = scalar_lea.hbm %s1418_s1, 512  ;;  %p1124_p8 = pneg %p1108_p6 }
  0x19   : > { %p769_p7 = scmp.ne.s32.totalorder %s1418_s1, %s768_s12  ;;  %p775_p11 = scmp.lt.u32.totalorder %s768_s12, %s1418_s1 }
  0x1b   : > { %p771_p9 = pnand %p1124_p8, %p769_p7 }
  0x1d   : > { %p772_p10 = pneg %p771_p9 }
  0x1f   : > { %p777_p12 = pnand %p775_p11, %p772_p10 }
  0x21   : > { %780 = shalt.err (!%p777_p12)
}
  0x22   : > { %s781_s18 = scalar_lea.vmem %s1097_s26, 512  ;;  %p789_p5 = scmp.lt.s32.totalorder %s1097_s26, %s1097_s26 }
  0x23   : > { %p782_p13 = scmp.ne.s32.totalorder %s1097_s26, %s781_s18  ;;  %p790_p4 = scmp.lt.s32.totalorder %s781_s18, %s781_s18 }
  0x25   : > { %p784_p0 = pnand %p782_p13, %p1124_p8  ;;  %p791_p7 = por %p790_p4, %p789_p5 }
  0x27   : > { %p785_p2 = pneg %p784_p0 }
  0x29   : > { %p792_p9 = pnand %p791_p7, %p785_p2 }
  0x2b   : > { %795 = shalt.err (!%p792_p9)
}
  0x2c   : > { %s1027_s19 = smov 128   ;;  %s1028_s20 = smov 8  }
  0x2d   : > { %694 = dma.hbm_to_vmem [thread:$0]  (!%p1108_p6), %s1418_s1, 512, %s1097_s26, [#allocation6], %s1027_s19, %s1027_s19, %s1028_s20  }
  0x2e   : > { %s1420_s4 = sld [smem:[#allocation22_spill]] }
  0x34   : > { %s796_s11 = scalar_lea.hbm %s1420_s4, 16 }
  0x35   : > { %p797_p4 = scmp.ne.s32.totalorder %s1420_s4, %s796_s11  ;;  %p803_p12 = scmp.lt.u32.totalorder %s796_s11, %s1420_s4 }
  0x37   : > { %p799_p10 = pnand %p797_p4, %p1124_p8 }
  0x39   : > { %p800_p11 = pneg %p799_p10 }
  0x3b   : > { %p805_p13 = pnand %p803_p12, %p800_p11 }
  0x3d   : > { %808 = shalt.err (!%p805_p13)
}
  0x3e   : > { %s809_s26 = scalar_lea.vmem %s1112_s30, 16  ;;  %s816_s17 = scalar_lea.vmem %s1112_s30, 32 }
  0x3f   : > { %p810_p0 = scmp.ne.s32.totalorder %s1112_s30, %s809_s26  ;;  %p817_p7 = scmp.lt.s32.totalorder %s1112_s30, %s1112_s30 }
  0x40   : > { %p818_p9 = scmp.lt.s32.totalorder %s816_s17, %s809_s26 }
  0x41   : > { %p812_p2 = pnand %p810_p0, %p1124_p8 }
  0x42   : > { %p819_p4 = por %p818_p9, %p817_p7 }
  0x43   : > { %p813_p5 = pneg %p812_p2 }
  0x45   : > { %p820_p10 = pnand %p819_p4, %p813_p5 }
  0x47   : > { %823 = shalt.err (!%p820_p10)
}
  0x48   : > { %700 = dma.hbm_to_vmem [thread:$0]  (!%p1108_p6), %s1420_s4, 16, %s1112_s30, [#allocation9]  }
  0x49   : > { %s1421_s2 = sld [smem:[#allocation21_spill]] }
  0x4f   : > { %s824_s29 = scalar_lea.hbm %s1421_s2, 16 }
  0x50   : > { %p825_p11 = scmp.ne.s32.totalorder %s1421_s2, %s824_s29  ;;  %p831_p0 = scmp.lt.u32.totalorder %s824_s29, %s1421_s2 }
  0x52   : > { %p827_p12 = pnand %p825_p11, %p1124_p8 }
  0x54   : > { %p828_p13 = pneg %p827_p12 }
  0x56   : > { %p833_p2 = pnand %p831_p0, %p828_p13 }
  0x58   : > { %836 = shalt.err (!%p833_p2)
}
  0x59   : > { %s837_s30 = scalar_lea.vmem %s1114_s9, 16  ;;  %s844_s13 = scalar_lea.vmem %s1114_s9, 32 }
  0x5a   : > { %p838_p5 = scmp.ne.s32.totalorder %s1114_s9, %s837_s30  ;;  %p845_p4 = scmp.lt.s32.totalorder %s1114_s9, %s1114_s9 }
  0x5b   : > { %p846_p10 = scmp.lt.s32.totalorder %s844_s13, %s837_s30 }
  0x5c   : > { %p840_p7 = pnand %p838_p5, %p1124_p8 }
  0x5d   : > { %p847_p11 = por %p846_p10, %p845_p4 }
  0x5e   : > { %p841_p9 = pneg %p840_p7 }
  0x60   : > { %p848_p12 = pnand %p847_p11, %p841_p9 }
  0x62   : > { %851 = shalt.err (!%p848_p12)
}
  0x63   : > { %697 = dma.hbm_to_vmem [thread:$0]  (!%p1108_p6), %s1421_s2, 16, %s1114_s9, [#allocation6]  }
  0x64   : > { %s1029_s26 = smov [#allocation11]   ;;  %s852_s20 = scalar_lea.hbm %s1407_s5, 16 }
  0x65   : > { %s242_s17 = sshll.u32 %s1029_s26, 4  ;;  %p853_p13 = scmp.ne.s32.totalorder %s1407_s5, %s852_s20  ;;  %s243_s17 = int_to_ptr.vmem [resolvable:$true] %s242_s17 }
  0x66   : > { %p859_p5 = scmp.lt.u32.totalorder %s852_s20, %s1407_s5 }
  0x67   : > { %p855_p0 = pnand %p853_p13, %p1124_p8 }
  0x69   : > { %p856_p2 = pneg %p855_p0 }
  0x6b   : > { %p861_p7 = pnand %p859_p5, %p856_p2 }
  0x6d   : > { %864 = shalt.err (!%p861_p7)
}
  0x6e   : > { %s865_s9 = scalar_lea.vmem %s243_s17, 16  ;;  %s872_s11 = scalar_lea.vmem %s243_s17, 32 }
  0x6f   : > { %p866_p9 = scmp.ne.s32.totalorder %s243_s17, %s865_s9  ;;  %p873_p11 = scmp.lt.s32.totalorder %s243_s17, %s243_s17 }
  0x70   : > { %p874_p12 = scmp.lt.s32.totalorder %s872_s11, %s865_s9 }
  0x71   : > { %p868_p4 = pnand %p866_p9, %p1124_p8 }
  0x72   : > { %p875_p1 = por %p874_p12, %p873_p11 }
  0x73   : > { %p869_p10 = pneg %p868_p4 }
  0x75   : > { %p876_p3 = pnand %p875_p1, %p869_p10 }
  0x77   : > { %879 = shalt.err (!%p876_p3)
}
  0x78   : > { %703 = dma.hbm_to_vmem [thread:$0]  (!%p1108_p6), %s1407_s5, 16, %s243_s17, [#allocation12]  }
  0x79   : > { %s620_s15 = sadd.s32 4294967294, %s1022_s24   ;;  %s1213_s7 = sadd.s32 1, %s1022_s24  }
  0x7a   : > { %s31_s13 = ssub.s32 %s1022_s24, %s1213_s7  ;;  %s34_s14 = sadd.s32 1, %s1018_s23 }
  0x7b   : > { %p32_p1 = scmp.eq.s32.totalorder %s31_s13, 0  ;;  %p41_p3 = scmp.ne.s32.totalorder %s1018_s23, %s1014_s22 }
  0x7c   : > { %p42_p8 = scmp.eq.s32.totalorder %s1022_s24, 0  ;;  %p47_p13 = scmp.ne.s32.totalorder %s1014_s22, %s1010_s21 }
  0x7d   : > { %s1224_s16 = scalar_select %p32_p1, %s1018_s23, %s34_s14  }
  0x7e   : > { %p1226_p0 = por %p42_p8, %p41_p3  ;;  %p1423_p2 = scmp.eq.s32.totalorder %s1092_s27, 0 }
  0x7f   : > { %p181_p5 = scmp.eq.s32.totalorder %s1092_s27, 1  ;;  %p187_p7 = scmp.eq.s32.totalorder %s620_s15, 1 }
  0x80   : > { %p1232_p6 = por %p1423_p2, %p47_p13  ;;  %p719_p9 = scmp.lt.s32.totalorder %s1022_s24, 2 }
  0x81   : > { %s253_s18 = sand.u32 1, %s1018_s23   ;;  %p1239_p4 = por %p181_p5, %p41_p3 }
  0x82   : > { %s1424_s17 = scalar_select %p1232_p6, 1, 0 }
  0x83   : > { %s1425_s19 = scalar_select %p1239_p4, 1, 0 }
  0x84   : > { %p1243_p10 = por %p187_p7, %p47_p13  ;;  %s1247_s25 = sshll.u32 %s253_s18, 3 }
  0x85   : > { %s628_s29 = sshll.u32 %s1022_s24, 7  ;;  %s257_s11 = scalar_lea.vmem [#allocation2], %s1247_s25 }
  0x86   : > { %s1426_s20 = scalar_select %p1243_p10, 1, 0 }
  0x87   : > { %s1253_s9 = scalar_lea.hbm %s1402_s0, %s628_s29  ;;  %s264_s12 = sshll.u32 %s257_s11, 4  ;;  %s1256_s12 = int_to_ptr.vmem [resolvable:$true] %s264_s12 }
  0x88   : > { %p1260_p11 = pnand %p719_p9, %p1226_p0  ;;  %s1267_s14 = scalar_lea.hbm %s1405_s3, %s628_s29 }
  0x89   : > { %s271_s8 = sand.u32 1, %s1022_s24   ;;  %s254_s10 = scalar_lea.sflag [#allocation3], %s253_s18 }
  0x8a   : > { %s880_s1 = scalar_lea.hbm %s1253_s9, 128  ;;  %p882_p1 = pneg %p1260_p11 }
  0x8b   : > { %p881_p12 = scmp.ne.s32.totalorder %s1253_s9, %s880_s1  ;;  %s885_s2 = scalar_lea.hbm %s1402_s0, 256 }
  0x8c   : > { %p886_p13 = scmp.lt.u32.totalorder %s1253_s9, %s1402_s0  ;;  %p887_p0 = scmp.lt.u32.totalorder %s885_s2, %s880_s1 }
  0x8d   : > { %p883_p3 = pnand %p882_p1, %p881_p12  ;;  %p889_p5 = scmp.lt.u32.totalorder %s880_s1, %s1253_s9 }
  0x8e   : > { %p888_p2 = por %p887_p0, %p886_p13 }
  0x8f   : > { %p884_p8 = pneg %p883_p3 }
  0x90   : > { %p890_p7 = por %p889_p5, %p888_p2 }
  0x92   : > { %p891_p9 = pnand %p890_p7, %p884_p8 }
  0x94   : > { %894 = shalt.err (!%p891_p9)
}
  0x95   : > { %s895_s18 = scalar_lea.vmem %s1256_s12, 128  ;;  %s1030_s29 = smov [#allocation2]  }
  0x96   : > { %p896_p12 = scmp.ne.s32.totalorder %s1256_s12, %s895_s18  ;;  %s900_s13 = sshll.u32 %s1030_s29, 4  ;;  %s901_s13 = int_to_ptr.vmem [resolvable:$false] %s900_s13 }
  0x97   : > { %s902_s4 = scalar_lea.vmem %s901_s13, 256  ;;  %p903_p4 = scmp.lt.s32.totalorder %s1256_s12, %s901_s13 }
  0x98   : > { %p898_p3 = pnand %p896_p12, %p882_p1  ;;  %p904_p13 = scmp.lt.s32.totalorder %s902_s4, %s895_s18 }
  0x9a   : > { %p899_p10 = pneg %p898_p3  ;;  %p905_p0 = por %p904_p13, %p903_p4 }
  0x9c   : > { %p906_p2 = pnand %p905_p0, %p899_p10 }
  0x9e   : > { %909 = shalt.err (!%p906_p2)
}
  0x9f   : > { %707 = dma.hbm_to_vmem [thread:$0]  (!%p1260_p11), %s1253_s9, 128, %s1256_s12, %s254_s10  }
  0xa0   : > { %s275_s1 = scalar_lea.vmem [#allocation8], %s1247_s25  ;;  %s272_s26 = scalar_lea.sflag [#allocation9], %s271_s8 }
  0xa1   : > { %s282_s2 = sshll.u32 %s275_s1, 4  ;;  %s910_s11 = scalar_lea.hbm %s1267_s14, 128  ;;  %s283_s2 = int_to_ptr.vmem [resolvable:$true] %s282_s2 }
  0xa2   : > { %p911_p4 = scmp.ne.s32.totalorder %s1267_s14, %s910_s11  ;;  %s915_s29 = scalar_lea.hbm %s1405_s3, 256 }
  0xa3   : > { %p916_p5 = scmp.lt.u32.totalorder %s1267_s14, %s1405_s3  ;;  %p917_p7 = scmp.lt.u32.totalorder %s915_s29, %s910_s11 }
  0xa4   : > { %p913_p10 = pnand %p911_p4, %p882_p1  ;;  %p919_p12 = scmp.lt.u32.totalorder %s910_s11, %s1267_s14 }
  0xa5   : > { %p918_p9 = por %p917_p7, %p916_p5 }
  0xa6   : > { %p914_p8 = pneg %p913_p10 }
  0xa7   : > { %p920_p3 = por %p919_p12, %p918_p9 }
  0xa9   : > { %p921_p13 = pnand %p920_p3, %p914_p8 }
  0xab   : > { %924 = shalt.err (!%p921_p13)
}
  0xac   : > { %s925_s25 = scalar_lea.vmem %s283_s2, 128  ;;  %s1031_s9 = smov [#allocation8]  }
  0xad   : > { %p926_p0 = scmp.ne.s32.totalorder %s283_s2, %s925_s25  ;;  %s930_s12 = sshll.u32 %s1031_s9, 4  ;;  %s931_s12 = int_to_ptr.vmem [resolvable:$false] %s930_s12 }
  0xae   : > { %s932_s8 = scalar_lea.vmem %s931_s12, 256  ;;  %p933_p10 = scmp.lt.s32.totalorder %s283_s2, %s931_s12 }
  0xaf   : > { %p928_p2 = pnand %p926_p0, %p882_p1  ;;  %p934_p6 = scmp.lt.s32.totalorder %s932_s8, %s925_s25 }
  0xb1   : > { %p929_p4 = pneg %p928_p2  ;;  %p935_p5 = por %p934_p6, %p933_p10 }
  0xb3   : > { %p936_p7 = pnand %p935_p5, %p929_p4 }
  0xb5   : > { %939 = shalt.err (!%p936_p7)
}
  0xb6   : > { %710 = dma.hbm_to_vmem [thread:$0]  (!%p1260_p11), %s1267_s14, 128, %s283_s2, %s272_s26  }
  0xb7   : > { %p1428_p8 = scmp.ne.s32.totalorder %s1416_s28, 0 }
  0xb8   : > { %s1320_s10 = sand.u32 (!%p1428_p8), 1, %s1014_s22   ;;  %p1429_p6 = scmp.ne.s32.totalorder (!%p1428_p8), %s1424_s17, 0 }
  0xb9   : > { %291 = sbr.rel (%p1428_p8) target bundleno = 759 (0x2f7), region = 44  ;;  %s1323_s1 = sshll.u32 (!%p1428_p8), %s1320_s10, 3 }
  0xba   : > { %s294_s11 = scalar_lea.sflag (!%p1428_p8), [#allocation3], %s1320_s10  ;;  %s297_s15 = scalar_lea.vmem (!%p1428_p8), [#allocation2], %s1323_s1 }
  0xc0   : > { %985 = dma.done.wait (%p1429_p6), %s294_s11, 128  }
  0xc1   : > { %987 = vsyncadd (%p1429_p6), %s294_s11, 4294967168  ;;  %p1430_p11 = scmp.eq.s32.totalorder %s1092_s27, 0 }
  0xc3   : > { %989 = dma.done.wait (%p1430_p11), [#allocation6], 528   ;;  %p1431_p1 = pmov %p1430_p11 }
  0xc4   : > { %s310_s28 = sand.u32 1, %s1092_s27   ;;  %s314_s14 = scalar_lea.vmem [#allocation8], %s1323_s1 }
  0xc5   : > { %991 = vsyncadd (%p1431_p1), [#allocation6], 4294966768  ;;  %s311_s30 = scalar_lea.sflag [#allocation9], %s310_s28 }
  0xc6   : > { %993 = dma.done.wait (%p1429_p6), %s311_s30, 128  }
  0xc7   : > { %995 = vsyncadd (%p1429_p6), %s311_s30, 4294967168  ;;  %p1432_p9 = pmov %p1431_p1 }
  0xc8   : > { %p1433_p12 = pmov %p1431_p1 }
  0xc9   : > { %997 = dma.done.wait (%p1432_p9), [#allocation9], 16  }
  0xca   : > { %999 = vsyncadd (%p1433_p12), [#allocation9], 4294967280  ;;  %p1434_p3 = pmov %p1431_p1 }
  0xcb   : > { %p1435_p13 = pmov %p1431_p1 }
  0xcc   : > { %1001 = dma.done.wait (%p1434_p3), [#allocation12], 16  }
  0xcd   : > { %1003 = vsyncadd (%p1435_p13), [#allocation12], 4294967280  ;;  %v1032_v0 = vmov 0.0|0.0   ;;  %vm1033_vm0 = vmmov 0   ;;  %v1034_v1 = vmov 0.0   ;;  %v357_v2 = vld [vmem:[#allocation5] sm:$0xff] }
  0xce   : > { %663 = vmatprep.subr.bf16.mxu0 %v1032_v0  ;;  %660 = vmatprep.mubr.msk.f32.mxu0 %vm1033_vm0, %v1034_v1  ;;  %v358_v3 = vld [vmem:[#allocation5 + $0x8] sm:$0xff]  ;;  %v359_v4 = vld [vmem:[#allocation5 + $0x10] sm:$0xff]  ;;  %v360_v6 = vld [vmem:[#allocation5 + $0x18] sm:$0xff]  ;;  %vm368_vm1 = vcmask 261120   ;;  %s644_s17 = sshll.u32 %s1092_s27, 7  ;;  %s355_s2 = scalar_lea.vmem [#allocation13], %s1323_s1 }
  0xcf   : > { %v664_v5 = vpack.c.bf16 %v358_v3, %v357_v2  ;;  %v667_v7 = vpack.c.bf16 %v360_v6, %v359_v4  ;;  %v356_v8 = vld [vmem:[%s297_s15] sm:$0xff]  ;;  %v639_v9 = vld [vmem:[#allocation7] ss:$0 sm:$0xff]  ;;  %v442_v11 = vld [vmem:[%s314_s14] sm:$0xff]  ;;  %s489_s26 = sshll.u32 %s355_s2, 4  ;;  %s1357_s13 = scalar_lea.hbm %s1408_s6, %s644_s17  ;;  %s1359_s26 = int_to_ptr.vmem [resolvable:$true] %s489_s26 }
  0xd0   : > { %v641_v25 = vld [vmem:[#allocation10] ss:$0 sm:$0xff]  ;;  %v642_v27 = vld [vmem:[#allocation11] ss:$0 sm:$0xff]  ;;  %s476_s4 = scalar_lea.sflag [#allocation4], %s1320_s10  ;;  %s940_s25 = scalar_lea.vmem %s1359_s26, 128 }
  0xd1   : > { %665 = vmatpush3.bf16.msra.mxu0 %v664_v5  ;;  %p941_p0 = scmp.ne.s32.totalorder %s1359_s26, %s940_s25  ;;  %p1436_p2 = scmp.ne.s32.totalorder %s1425_s19, 0 }
  0xd2   : > { %666 = vmatprep.subr.bf16.mxu0 %v1032_v0  ;;  %s1035_s27 = smov [#allocation13]  }
  0xd3   : > { %p942_p4 = pnand %p941_p0, %p1436_p2  ;;  %s944_s9 = sshll.u32 %s1035_s27, 4  ;;  %s945_s9 = int_to_ptr.vmem [resolvable:$false] %s944_s9 }
  0xd4   : > { %s946_s12 = scalar_lea.vmem %s945_s9, 256  ;;  %p947_p5 = scmp.lt.s32.totalorder %s1359_s26, %s945_s9 }
  0xd5   : > { %668 = vmatpush3.bf16.msra.mxu0 %v667_v7  ;;  %p943_p10 = pneg %p942_p4  ;;  %p948_p7 = scmp.lt.s32.totalorder %s946_s12, %s940_s25 }
  0xd7   : > { %p949_p8 = por %p948_p7, %p947_p5 }
  0xd8   : > { %661 = vmatmul.mubr.msk.f32.vlgmr.msra.gmra.mrb[0].mxu0 %vm368_vm1, %v356_v8 }
  0xd9   : > { %p950_p6 = pnand %p949_p8, %p943_p10 }
 0x1ab   : > { %v438_v10 = vpop.f32.mrb[0].mxu0 }
 0x1ac   : > { %v439_v12 = vadd.f32 %v639_v9, %v438_v10  ;;  %v662_v13 = vpop.f32.mrb[1].mxu0 }
 0x1ae   : > { %v443_v14 = vadd.f32 %v442_v11, %v439_v12 }
 0x1b0   : > { %v444_v15 = vsel %vm368_vm1, %v443_v14, 0.0 }
 0x1b1   : > { %445 = vadd.xlane.f32.xlu0 %v444_v15 }
 0x23e   : > { %v446_v16 = vpop.xlane.xlu0 %445 }
 0x23f   : > { %v448_v17 = vmul.f32 0.03125, %v446_v16 }
 0x241   : > { %v449_v18 = vsub.f32 %v443_v14, %v448_v17 }
 0x243   : > { %v450_v19 = vmul.f32 %v449_v18, %v449_v18 }
 0x245   : > { %v451_v20 = vsel %vm368_vm1, %v450_v19, 0.0 }
 0x246   : > { %452 = vadd.xlane.f32.xlu0 %v451_v20 }
 0x2d3   : > { %v453_v21 = vpop.xlane.xlu0 %452 }
 0x2d4   : > { %v454_v22 = vmul.f32 0.03125, %v453_v21 }
 0x2d6   : > { %v455_v23 = vadd.f32 1e-12, %v454_v22 }
 0x2d8   : > { %766 = vrsqrt.f32 %v455_v23 }
 0x2e2   : > { %v767_v24 = vpop.eup %766 }
 0x2e3   : > { %v457_v26 = vmul.f32 %v767_v24, %v449_v18 }
 0x2e5   : > { %v465_v28 = vmul.f32 %v641_v25, %v457_v26 }
 0x2e7   : > { %v473_v29 = vadd.f32 %v642_v27, %v465_v28 }
 0x2e9   : > { %474 = vst.msk [vmem:[%s355_s2] sm:$0xff] %vm368_vm1, %v473_v29 }
 0x2ea   : > { %953 = shalt.err (!%p950_p6)
}
 0x2eb   : > { %s954_s8 = scalar_lea.hbm %s1357_s13, 128  ;;  %s958_s11 = scalar_lea.hbm %s1408_s6, 256 }
 0x2ec   : > { %p955_p11 = scmp.ne.s32.totalorder %s1357_s13, %s954_s8  ;;  %p959_p12 = scmp.lt.u32.totalorder %s1357_s13, %s1408_s6 }
 0x2ed   : > { %p960_p3 = scmp.lt.u32.totalorder %s958_s11, %s954_s8  ;;  %p962_p0 = scmp.lt.u32.totalorder %s954_s8, %s1357_s13 }
 0x2ee   : > { %p956_p1 = pnand %p955_p11, %p1436_p2 }
 0x2ef   : > { %p961_p13 = por %p960_p3, %p959_p12 }
 0x2f0   : > { %p957_p9 = pneg %p956_p1 }
 0x2f1   : > { %p963_p4 = por %p962_p0, %p961_p13 }
 0x2f3   : > { %p964_p10 = pnand %p963_p4, %p957_p9 }
 0x2f5   : > { %967 = shalt.err (!%p964_p10)
}
 0x2f6   : > { %689 = dma.vmem_to_hbm [thread:$0]  (%p1436_p2), %s1359_s26, 128, %s1357_s13, %s476_s4  }
 0x2f7 PF: > { %s501_s30 = sand.u32 1, %s1010_s21   ;;  %p1437_p5 = scmp.ne.s32.totalorder %s1426_s20, 0 }
 0x2f8   : > { %p1438_p7 = scmp.ge.s32.totalorder %s1022_s24, 2  ;;  %s502_s14 = scalar_lea.sflag [#allocation4], %s501_s30 }
 0x2fa   : > { %p712_p8 = pnand %p1438_p7, %p1437_p5 }
 0x2fc   : > { %1005 = dma.done.wait (!%p712_p8), %s502_s14, 128  }
 0x2fd   : > { %1007 = vsyncadd (!%p712_p8), %s502_s14, 4294967168  ;;  %p24_p6 = scmp.ge.s32.totalorder %s1213_s7, 4   ;;  %s1439_s21 = smov %s1014_s22 }
 0x2fe   : > { %s1440_s22 = smov %s1018_s23  ;;  %s1441_s23 = smov %s1224_s16 }
 0x2ff   : > { %s1442_s24 = smov %s1213_s7  ;;  %26 = sbr.rel (!%p24_p6) target bundleno = 13 (0xd), region = 118 }
 0x306   :  { %507 = vsyncpa [#allocation3], 1 }
 0x307   :  { %509 = vsyncpa [#allocation3 + $0x1], 1 }
 0x308   :  { %510 = vsyncpa [#allocation6], 1 }
 0x309   :  { %511 = vsyncpa [#allocation9], 1 }
 0x30a   :  { %513 = vsyncpa [#allocation9 + $0x1], 1 }
 0x30b   :  { %514 = vsyncpa [#allocation12], 1 }
 0x30c   :  { %515 = vsyncpa [#allocation4], 1 }
 0x30d   :  { %517 = vsyncpa [#allocation4 + $0x1], 1 }

// kernel: tpu_custom_call.1
= control target key start
LH: loop header
LB: loop body
LE: loop exit
PB: predicated region body
PF: predicated region fallthrough
CT: control target
= control target key end

     0   :  { %s1402_s0 = inlined_call_operand.hbm [shape: f32[16,32], index: 0, kind: input, shape index: {}]   ;;  %s1403_s1 = inlined_call_operand.hbm [shape: f32[32,32], index: 1, kind: input, shape index: {}]   ;;  %s1404_s2 = inlined_call_operand.hbm [shape: f32[1,32], index: 2, kind: input, shape index: {}]   ;;  %s1405_s3 = inlined_call_operand.hbm [shape: f32[16,32], index: 3, kind: input, shape index: {}]   ;;  %s1406_s4 = inlined_call_operand.hbm [shape: f32[1,32], index: 4, kind: input, shape index: {}]   ;;  %s1407_s5 = inlined_call_operand.hbm [shape: f32[1,32], index: 5, kind: input, shape index: {}]   ;;  %s1408_s6 = inlined_call_operand.hbm [shape: f32[16,32], index: 6, kind: output, shape index: {}]  }
   0x1   :  { %1413 = sst [smem:[#allocation20_spill]] %s1403_s1 }
   0x2   :  { %1414 = sst [smem:[#allocation21_spill]] %s1404_s2 }
   0x3   :  { %1415 = sst [smem:[#allocation22_spill]] %s1406_s4 }
   0x4   :  { %11 = vsyncpa [#allocation3], 0 }
   0x5   :  { %13 = vsyncpa [#allocation3 + $0x1], 0 }
   0x6   :  { %14 = vsyncpa [#allocation6], 0 }
   0x7   :  { %15 = vsyncpa [#allocation9], 0 }
   0x8   :  { %17 = vsyncpa [#allocation9 + $0x1], 0 }
   0x9   :  { %18 = vsyncpa [#allocation12], 0 }
   0xa   :  { %19 = vsyncpa [#allocation4], 0 }
   0xb   :  { %21 = vsyncpa [#allocation4 + $0x1], 0  ;;  %s1071_s21 = smov 0   ;;  %s1073_s22 = smov 0  }
   0xc   :  { %s1075_s23 = smov 0   ;;  %s1077_s24 = smov 0  }
   0xd LB: > { %s1024_s25 = smov [#allocation5]   ;;  %s1092_s27 = sadd.s32 4294967295, %s1022_s24   ;;  %s1022_s24 = sphi %s1077_s24, %s1442_s24   ;;  %s1018_s23 = sphi %s1075_s23, %s1441_s23   ;;  %s1014_s22 = sphi %s1073_s22, %s1440_s22   ;;  %s1010_s21 = sphi %s1071_s21, %s1439_s21  }
   0xe   : > { %s206_s26 = sshll.u32 %s1024_s25, 4  ;;  %p621_p0 = scmp.ge.s32.totalorder %s1022_s24, 1  ;;  %s1097_s26 = int_to_ptr.vmem [resolvable:$true] %s206_s26 }
   0xf   : > { %p1409_p1 = scmp.eq.s32.totalorder %s1092_s27, 0  ;;  %p194_p2 = scmp.lt.s32.totalorder %s1022_s24, 3 }
  0x10   : > { %s1025_s29 = smov [#allocation10]   ;;  %s1026_s8 = smov [#allocation7]  }
  0x11   : > { %p1099_p3 = pnand %p621_p0, %p194_p2  ;;  %s231_s30 = sshll.u32 %s1025_s29, 4  ;;  %s1112_s30 = int_to_ptr.vmem [resolvable:$true] %s231_s30 }
  0x12   : > { %s220_s9 = sshll.u32 %s1026_s8, 4  ;;  %s1418_s1 = sld [smem:[#allocation20_spill]]  ;;  %s1114_s9 = int_to_ptr.vmem [resolvable:$true] %s220_s9 }
  0x13   : > { %s1416_s28 = scalar_select %p1099_p3, 1, 0 }
  0x14   : > { %p691_p5 = pneg %p1099_p3 }
  0x16   : > { %p1108_p6 = pnand %p691_p5, %p1409_p1 }
  0x18   : > { %s768_s12 = scalar_lea.hbm %s1418_s1, 512  ;;  %p1124_p8 = pneg %p1108_p6 }
  0x19   : > { %p769_p7 = scmp.ne.s32.totalorder %s1418_s1, %s768_s12  ;;  %p775_p11 = scmp.lt.u32.totalorder %s768_s12, %s1418_s1 }
  0x1b   : > { %p771_p9 = pnand %p1124_p8, %p769_p7 }
  0x1d   : > { %p772_p10 = pneg %p771_p9 }
  0x1f   : > { %p777_p12 = pnand %p775_p11, %p772_p10 }
  0x21   : > { %780 = shalt.err (!%p777_p12)
}
  0x22   : > { %s781_s18 = scalar_lea.vmem %s1097_s26, 512  ;;  %p789_p5 = scmp.lt.s32.totalorder %s1097_s26, %s1097_s26 }
  0x23   : > { %p782_p13 = scmp.ne.s32.totalorder %s1097_s26, %s781_s18  ;;  %p790_p4 = scmp.lt.s32.totalorder %s781_s18, %s781_s18 }
  0x25   : > { %p784_p0 = pnand %p782_p13, %p1124_p8  ;;  %p791_p7 = por %p790_p4, %p789_p5 }
  0x27   : > { %p785_p2 = pneg %p784_p0 }
  0x29   : > { %p792_p9 = pnand %p791_p7, %p785_p2 }
  0x2b   : > { %795 = shalt.err (!%p792_p9)
}
  0x2c   : > { %s1027_s19 = smov 128   ;;  %s1028_s20 = smov 8  }
  0x2d   : > { %694 = dma.hbm_to_vmem [thread:$0]  (!%p1108_p6), %s1418_s1, 512, %s1097_s26, [#allocation6], %s1027_s19, %s1027_s19, %s1028_s20  }
  0x2e   : > { %s1420_s4 = sld [smem:[#allocation22_spill]] }
  0x34   : > { %s796_s11 = scalar_lea.hbm %s1420_s4, 16 }
  0x35   : > { %p797_p4 = scmp.ne.s32.totalorder %s1420_s4, %s796_s11  ;;  %p803_p12 = scmp.lt.u32.totalorder %s796_s11, %s1420_s4 }
  0x37   : > { %p799_p10 = pnand %p797_p4, %p1124_p8 }
  0x39   : > { %p800_p11 = pneg %p799_p10 }
  0x3b   : > { %p805_p13 = pnand %p803_p12, %p800_p11 }
  0x3d   : > { %808 = shalt.err (!%p805_p13)
}
  0x3e   : > { %s809_s26 = scalar_lea.vmem %s1112_s30, 16  ;;  %s816_s17 = scalar_lea.vmem %s1112_s30, 32 }
  0x3f   : > { %p810_p0 = scmp.ne.s32.totalorder %s1112_s30, %s809_s26  ;;  %p817_p7 = scmp.lt.s32.totalorder %s1112_s30, %s1112_s30 }
  0x40   : > { %p818_p9 = scmp.lt.s32.totalorder %s816_s17, %s809_s26 }
  0x41   : > { %p812_p2 = pnand %p810_p0, %p1124_p8 }
  0x42   : > { %p819_p4 = por %p818_p9, %p817_p7 }
  0x43   : > { %p813_p5 = pneg %p812_p2 }
  0x45   : > { %p820_p10 = pnand %p819_p4, %p813_p5 }
  0x47   : > { %823 = shalt.err (!%p820_p10)
}
  0x48   : > { %700 = dma.hbm_to_vmem [thread:$0]  (!%p1108_p6), %s1420_s4, 16, %s1112_s30, [#allocation9]  }
  0x49   : > { %s1421_s2 = sld [smem:[#allocation21_spill]] }
  0x4f   : > { %s824_s29 = scalar_lea.hbm %s1421_s2, 16 }
  0x50   : > { %p825_p11 = scmp.ne.s32.totalorder %s1421_s2, %s824_s29  ;;  %p831_p0 = scmp.lt.u32.totalorder %s824_s29, %s1421_s2 }
  0x52   : > { %p827_p12 = pnand %p825_p11, %p1124_p8 }
  0x54   : > { %p828_p13 = pneg %p827_p12 }
  0x56   : > { %p833_p2 = pnand %p831_p0, %p828_p13 }
  0x58   : > { %836 = shalt.err (!%p833_p2)
}
  0x59   : > { %s837_s30 = scalar_lea.vmem %s1114_s9, 16  ;;  %s844_s13 = scalar_lea.vmem %s1114_s9, 32 }
  0x5a   : > { %p838_p5 = scmp.ne.s32.totalorder %s1114_s9, %s837_s30  ;;  %p845_p4 = scmp.lt.s32.totalorder %s1114_s9, %s1114_s9 }
  0x5b   : > { %p846_p10 = scmp.lt.s32.totalorder %s844_s13, %s837_s30 }
  0x5c   : > { %p840_p7 = pnand %p838_p5, %p1124_p8 }
  0x5d   : > { %p847_p11 = por %p846_p10, %p845_p4 }
  0x5e   : > { %p841_p9 = pneg %p840_p7 }
  0x60   : > { %p848_p12 = pnand %p847_p11, %p841_p9 }
  0x62   : > { %851 = shalt.err (!%p848_p12)
}
  0x63   : > { %697 = dma.hbm_to_vmem [thread:$0]  (!%p1108_p6), %s1421_s2, 16, %s1114_s9, [#allocation6]  }
  0x64   : > { %s1029_s26 = smov [#allocation11]   ;;  %s852_s20 = scalar_lea.hbm %s1407_s5, 16 }
  0x65   : > { %s242_s17 = sshll.u32 %s1029_s26, 4  ;;  %p853_p13 = scmp.ne.s32.totalorder %s1407_s5, %s852_s20  ;;  %s243_s17 = int_to_ptr.vmem [resolvable:$true] %s242_s17 }
  0x66   : > { %p859_p5 = scmp.lt.u32.totalorder %s852_s20, %s1407_s5 }
  0x67   : > { %p855_p0 = pnand %p853_p13, %p1124_p8 }
  0x69   : > { %p856_p2 = pneg %p855_p0 }
  0x6b   : > { %p861_p7 = pnand %p859_p5, %p856_p2 }
  0x6d   : > { %864 = shalt.err (!%p861_p7)
}
  0x6e   : > { %s865_s9 = scalar_lea.vmem %s243_s17, 16  ;;  %s872_s11 = scalar_lea.vmem %s243_s17, 32 }
  0x6f   : > { %p866_p9 = scmp.ne.s32.totalorder %s243_s17, %s865_s9  ;;  %p873_p11 = scmp.lt.s32.totalorder %s243_s17, %s243_s17 }
  0x70   : > { %p874_p12 = scmp.lt.s32.totalorder %s872_s11, %s865_s9 }
  0x71   : > { %p868_p4 = pnand %p866_p9, %p1124_p8 }
  0x72   : > { %p875_p1 = por %p874_p12, %p873_p11 }
  0x73   : > { %p869_p10 = pneg %p868_p4 }
  0x75   : > { %p876_p3 = pnand %p875_p1, %p869_p10 }
  0x77   : > { %879 = shalt.err (!%p876_p3)
}
  0x78   : > { %703 = dma.hbm_to_vmem [thread:$0]  (!%p1108_p6), %s1407_s5, 16, %s243_s17, [#allocation12]  }
  0x79   : > { %s620_s15 = sadd.s32 4294967294, %s1022_s24   ;;  %s1213_s7 = sadd.s32 1, %s1022_s24  }
  0x7a   : > { %s31_s13 = ssub.s32 %s1022_s24, %s1213_s7  ;;  %s34_s14 = sadd.s32 1, %s1018_s23 }
  0x7b   : > { %p32_p1 = scmp.eq.s32.totalorder %s31_s13, 0  ;;  %p41_p3 = scmp.ne.s32.totalorder %s1018_s23, %s1014_s22 }
  0x7c   : > { %p42_p8 = scmp.eq.s32.totalorder %s1022_s24, 0  ;;  %p47_p13 = scmp.ne.s32.totalorder %s1014_s22, %s1010_s21 }
  0x7d   : > { %s1224_s16 = scalar_select %p32_p1, %s1018_s23, %s34_s14  }
  0x7e   : > { %p1226_p0 = por %p42_p8, %p41_p3  ;;  %p1423_p2 = scmp.eq.s32.totalorder %s1092_s27, 0 }
  0x7f   : > { %p181_p5 = scmp.eq.s32.totalorder %s1092_s27, 1  ;;  %p187_p7 = scmp.eq.s32.totalorder %s620_s15, 1 }
  0x80   : > { %p1232_p6 = por %p1423_p2, %p47_p13  ;;  %p719_p9 = scmp.lt.s32.totalorder %s1022_s24, 2 }
  0x81   : > { %s253_s18 = sand.u32 1, %s1018_s23   ;;  %p1239_p4 = por %p181_p5, %p41_p3 }
  0x82   : > { %s1424_s17 = scalar_select %p1232_p6, 1, 0 }
  0x83   : > { %s1425_s19 = scalar_select %p1239_p4, 1, 0 }
  0x84   : > { %p1243_p10 = por %p187_p7, %p47_p13  ;;  %s1247_s25 = sshll.u32 %s253_s18, 3 }
  0x85   : > { %s628_s29 = sshll.u32 %s1022_s24, 7  ;;  %s257_s11 = scalar_lea.vmem [#allocation2], %s1247_s25 }
  0x86   : > { %s1426_s20 = scalar_select %p1243_p10, 1, 0 }
  0x87   : > { %s1253_s9 = scalar_lea.hbm %s1402_s0, %s628_s29  ;;  %s264_s12 = sshll.u32 %s257_s11, 4  ;;  %s1256_s12 = int_to_ptr.vmem [resolvable:$true] %s264_s12 }
  0x88   : > { %p1260_p11 = pnand %p719_p9, %p1226_p0  ;;  %s1267_s14 = scalar_lea.hbm %s1405_s3, %s628_s29 }
  0x89   : > { %s271_s8 = sand.u32 1, %s1022_s24   ;;  %s254_s10 = scalar_lea.sflag [#allocation3], %s253_s18 }
  0x8a   : > { %s880_s1 = scalar_lea.hbm %s1253_s9, 128  ;;  %p882_p1 = pneg %p1260_p11 }
  0x8b   : > { %p881_p12 = scmp.ne.s32.totalorder %s1253_s9, %s880_s1  ;;  %s885_s2 = scalar_lea.hbm %s1402_s0, 256 }
  0x8c   : > { %p886_p13 = scmp.lt.u32.totalorder %s1253_s9, %s1402_s0  ;;  %p887_p0 = scmp.lt.u32.totalorder %s885_s2, %s880_s1 }
  0x8d   : > { %p883_p3 = pnand %p882_p1, %p881_p12  ;;  %p889_p5 = scmp.lt.u32.totalorder %s880_s1, %s1253_s9 }
  0x8e   : > { %p888_p2 = por %p887_p0, %p886_p13 }
  0x8f   : > { %p884_p8 = pneg %p883_p3 }
  0x90   : > { %p890_p7 = por %p889_p5, %p888_p2 }
  0x92   : > { %p891_p9 = pnand %p890_p7, %p884_p8 }
  0x94   : > { %894 = shalt.err (!%p891_p9)
}
  0x95   : > { %s895_s18 = scalar_lea.vmem %s1256_s12, 128  ;;  %s1030_s29 = smov [#allocation2]  }
  0x96   : > { %p896_p12 = scmp.ne.s32.totalorder %s1256_s12, %s895_s18  ;;  %s900_s13 = sshll.u32 %s1030_s29, 4  ;;  %s901_s13 = int_to_ptr.vmem [resolvable:$false] %s900_s13 }
  0x97   : > { %s902_s4 = scalar_lea.vmem %s901_s13, 256  ;;  %p903_p4 = scmp.lt.s32.totalorder %s1256_s12, %s901_s13 }
  0x98   : > { %p898_p3 = pnand %p896_p12, %p882_p1  ;;  %p904_p13 = scmp.lt.s32.totalorder %s902_s4, %s895_s18 }
  0x9a   : > { %p899_p10 = pneg %p898_p3  ;;  %p905_p0 = por %p904_p13, %p903_p4 }
  0x9c   : > { %p906_p2 = pnand %p905_p0, %p899_p10 }
  0x9e   : > { %909 = shalt.err (!%p906_p2)
}
  0x9f   : > { %707 = dma.hbm_to_vmem [thread:$0]  (!%p1260_p11), %s1253_s9, 128, %s1256_s12, %s254_s10  }
  0xa0   : > { %s275_s1 = scalar_lea.vmem [#allocation8], %s1247_s25  ;;  %s272_s26 = scalar_lea.sflag [#allocation9], %s271_s8 }
  0xa1   : > { %s282_s2 = sshll.u32 %s275_s1, 4  ;;  %s910_s11 = scalar_lea.hbm %s1267_s14, 128  ;;  %s283_s2 = int_to_ptr.vmem [resolvable:$true] %s282_s2 }
  0xa2   : > { %p911_p4 = scmp.ne.s32.totalorder %s1267_s14, %s910_s11  ;;  %s915_s29 = scalar_lea.hbm %s1405_s3, 256 }
  0xa3   : > { %p916_p5 = scmp.lt.u32.totalorder %s1267_s14, %s1405_s3  ;;  %p917_p7 = scmp.lt.u32.totalorder %s915_s29, %s910_s11 }
  0xa4   : > { %p913_p10 = pnand %p911_p4, %p882_p1  ;;  %p919_p12 = scmp.lt.u32.totalorder %s910_s11, %s1267_s14 }
  0xa5   : > { %p918_p9 = por %p917_p7, %p916_p5 }
  0xa6   : > { %p914_p8 = pneg %p913_p10 }
  0xa7   : > { %p920_p3 = por %p919_p12, %p918_p9 }
  0xa9   : > { %p921_p13 = pnand %p920_p3, %p914_p8 }
  0xab   : > { %924 = shalt.err (!%p921_p13)
}
  0xac   : > { %s925_s25 = scalar_lea.vmem %s283_s2, 128  ;;  %s1031_s9 = smov [#allocation8]  }
  0xad   : > { %p926_p0 = scmp.ne.s32.totalorder %s283_s2, %s925_s25  ;;  %s930_s12 = sshll.u32 %s1031_s9, 4  ;;  %s931_s12 = int_to_ptr.vmem [resolvable:$false] %s930_s12 }
  0xae   : > { %s932_s8 = scalar_lea.vmem %s931_s12, 256  ;;  %p933_p10 = scmp.lt.s32.totalorder %s283_s2, %s931_s12 }
  0xaf   : > { %p928_p2 = pnand %p926_p0, %p882_p1  ;;  %p934_p6 = scmp.lt.s32.totalorder %s932_s8, %s925_s25 }
  0xb1   : > { %p929_p4 = pneg %p928_p2  ;;  %p935_p5 = por %p934_p6, %p933_p10 }
  0xb3   : > { %p936_p7 = pnand %p935_p5, %p929_p4 }
  0xb5   : > { %939 = shalt.err (!%p936_p7)
}
  0xb6   : > { %710 = dma.hbm_to_vmem [thread:$0]  (!%p1260_p11), %s1267_s14, 128, %s283_s2, %s272_s26  }
  0xb7   : > { %p1428_p8 = scmp.ne.s32.totalorder %s1416_s28, 0 }
  0xb8   : > { %s1320_s10 = sand.u32 (!%p1428_p8), 1, %s1014_s22   ;;  %p1429_p6 = scmp.ne.s32.totalorder (!%p1428_p8), %s1424_s17, 0 }
  0xb9   : > { %291 = sbr.rel (%p1428_p8) target bundleno = 759 (0x2f7), region = 44  ;;  %s1323_s1 = sshll.u32 (!%p1428_p8), %s1320_s10, 3 }
  0xba   : > { %s294_s11 = scalar_lea.sflag (!%p1428_p8), [#allocation3], %s1320_s10  ;;  %s297_s15 = scalar_lea.vmem (!%p1428_p8), [#allocation2], %s1323_s1 }
  0xc0   : > { %985 = dma.done.wait (%p1429_p6), %s294_s11, 128  }
  0xc1   : > { %987 = vsyncadd (%p1429_p6), %s294_s11, 4294967168  ;;  %p1430_p11 = scmp.eq.s32.totalorder %s1092_s27, 0 }
  0xc3   : > { %989 = dma.done.wait (%p1430_p11), [#allocation6], 528   ;;  %p1431_p1 = pmov %p1430_p11 }
  0xc4   : > { %s310_s28 = sand.u32 1, %s1092_s27   ;;  %s314_s14 = scalar_lea.vmem [#allocation8], %s1323_s1 }
  0xc5   : > { %991 = vsyncadd (%p1431_p1), [#allocation6], 4294966768  ;;  %s311_s30 = scalar_lea.sflag [#allocation9], %s310_s28 }
  0xc6   : > { %993 = dma.done.wait (%p1429_p6), %s311_s30, 128  }
  0xc7   : > { %995 = vsyncadd (%p1429_p6), %s311_s30, 4294967168  ;;  %p1432_p9 = pmov %p1431_p1 }
  0xc8   : > { %p1433_p12 = pmov %p1431_p1 }
  0xc9   : > { %997 = dma.done.wait (%p1432_p9), [#allocation9], 16  }
  0xca   : > { %999 = vsyncadd (%p1433_p12), [#allocation9], 4294967280  ;;  %p1434_p3 = pmov %p1431_p1 }
  0xcb   : > { %p1435_p13 = pmov %p1431_p1 }
  0xcc   : > { %1001 = dma.done.wait (%p1434_p3), [#allocation12], 16  }
  0xcd   : > { %1003 = vsyncadd (%p1435_p13), [#allocation12], 4294967280  ;;  %v1032_v0 = vmov 0.0|0.0   ;;  %vm1033_vm0 = vmmov 0   ;;  %v1034_v1 = vmov 0.0   ;;  %v357_v2 = vld [vmem:[#allocation5] sm:$0xff] }
  0xce   : > { %663 = vmatprep.subr.bf16.mxu0 %v1032_v0  ;;  %660 = vmatprep.mubr.msk.f32.mxu0 %vm1033_vm0, %v1034_v1  ;;  %v358_v3 = vld [vmem:[#allocation5 + $0x8] sm:$0xff]  ;;  %v359_v4 = vld [vmem:[#allocation5 + $0x10] sm:$0xff]  ;;  %v360_v6 = vld [vmem:[#allocation5 + $0x18] sm:$0xff]  ;;  %vm368_vm1 = vcmask 261120   ;;  %s644_s17 = sshll.u32 %s1092_s27, 7  ;;  %s355_s2 = scalar_lea.vmem [#allocation13], %s1323_s1 }
  0xcf   : > { %v664_v5 = vpack.c.bf16 %v358_v3, %v357_v2  ;;  %v667_v7 = vpack.c.bf16 %v360_v6, %v359_v4  ;;  %v356_v8 = vld [vmem:[%s297_s15] sm:$0xff]  ;;  %v639_v9 = vld [vmem:[#allocation7] ss:$0 sm:$0xff]  ;;  %v442_v11 = vld [vmem:[%s314_s14] sm:$0xff]  ;;  %s489_s26 = sshll.u32 %s355_s2, 4  ;;  %s1357_s13 = scalar_lea.hbm %s1408_s6, %s644_s17  ;;  %s1359_s26 = int_to_ptr.vmem [resolvable:$true] %s489_s26 }
  0xd0   : > { %v641_v25 = vld [vmem:[#allocation10] ss:$0 sm:$0xff]  ;;  %v642_v27 = vld [vmem:[#allocation11] ss:$0 sm:$0xff]  ;;  %s476_s4 = scalar_lea.sflag [#allocation4], %s1320_s10  ;;  %s940_s25 = scalar_lea.vmem %s1359_s26, 128 }
  0xd1   : > { %665 = vmatpush3.bf16.msra.mxu0 %v664_v5  ;;  %p941_p0 = scmp.ne.s32.totalorder %s1359_s26, %s940_s25  ;;  %p1436_p2 = scmp.ne.s32.totalorder %s1425_s19, 0 }
  0xd2   : > { %666 = vmatprep.subr.bf16.mxu0 %v1032_v0  ;;  %s1035_s27 = smov [#allocation13]  }
  0xd3   : > { %p942_p4 = pnand %p941_p0, %p1436_p2  ;;  %s944_s9 = sshll.u32 %s1035_s27, 4  ;;  %s945_s9 = int_to_ptr.vmem [resolvable:$false] %s944_s9 }
  0xd4   : > { %s946_s12 = scalar_lea.vmem %s945_s9, 256  ;;  %p947_p5 = scmp.lt.s32.totalorder %s1359_s26, %s945_s9 }
  0xd5   : > { %668 = vmatpush3.bf16.msra.mxu0 %v667_v7  ;;  %p943_p10 = pneg %p942_p4  ;;  %p948_p7 = scmp.lt.s32.totalorder %s946_s12, %s940_s25 }
  0xd7   : > { %p949_p8 = por %p948_p7, %p947_p5 }
  0xd8   : > { %661 = vmatmul.mubr.msk.f32.vlgmr.msra.gmra.mrb[0].mxu0 %vm368_vm1, %v356_v8 }
  0xd9   : > { %p950_p6 = pnand %p949_p8, %p943_p10 }
 0x1ab   : > { %v438_v10 = vpop.f32.mrb[0].mxu0 }
 0x1ac   : > { %v439_v12 = vadd.f32 %v639_v9, %v438_v10  ;;  %v662_v13 = vpop.f32.mrb[1].mxu0 }
 0x1ae   : > { %v443_v14 = vadd.f32 %v442_v11, %v439_v12 }
 0x1b0   : > { %v444_v15 = vsel %vm368_vm1, %v443_v14, 0.0 }
 0x1b1   : > { %445 = vadd.xlane.f32.xlu0 %v444_v15 }
 0x23e   : > { %v446_v16 = vpop.xlane.xlu0 %445 }
 0x23f   : > { %v448_v17 = vmul.f32 0.03125, %v446_v16 }
 0x241   : > { %v449_v18 = vsub.f32 %v443_v14, %v448_v17 }
 0x243   : > { %v450_v19 = vmul.f32 %v449_v18, %v449_v18 }
 0x245   : > { %v451_v20 = vsel %vm368_vm1, %v450_v19, 0.0 }
 0x246   : > { %452 = vadd.xlane.f32.xlu0 %v451_v20 }
 0x2d3   : > { %v453_v21 = vpop.xlane.xlu0 %452 }
 0x2d4   : > { %v454_v22 = vmul.f32 0.03125, %v453_v21 }
 0x2d6   : > { %v455_v23 = vadd.f32 1e-12, %v454_v22 }
 0x2d8   : > { %766 = vrsqrt.f32 %v455_v23 }
 0x2e2   : > { %v767_v24 = vpop.eup %766 }
 0x2e3   : > { %v457_v26 = vmul.f32 %v767_v24, %v449_v18 }
 0x2e5   : > { %v465_v28 = vmul.f32 %v641_v25, %v457_v26 }
 0x2e7   : > { %v473_v29 = vadd.f32 %v642_v27, %v465_v28 }
 0x2e9   : > { %474 = vst.msk [vmem:[%s355_s2] sm:$0xff] %vm368_vm1, %v473_v29 }
 0x2ea   : > { %953 = shalt.err (!%p950_p6)
}
 0x2eb   : > { %s954_s8 = scalar_lea.hbm %s1357_s13, 128  ;;  %s958_s11 = scalar_lea.hbm %s1408_s6, 256 }
 0x2ec   : > { %p955_p11 = scmp.ne.s32.totalorder %s1357_s13, %s954_s8  ;;  %p959_p12 = scmp.lt.u32.totalorder %s1357_s13, %s1408_s6 }
 0x2ed   : > { %p960_p3 = scmp.lt.u32.totalorder %s958_s11, %s954_s8  ;;  %p962_p0 = scmp.lt.u32.totalorder %s954_s8, %s1357_s13 }
 0x2ee   : > { %p956_p1 = pnand %p955_p11, %p1436_p2 }
 0x2ef   : > { %p961_p13 = por %p960_p3, %p959_p12 }
 0x2f0   : > { %p957_p9 = pneg %p956_p1 }
 0x2f1   : > { %p963_p4 = por %p962_p0, %p961_p13 }
 0x2f3   : > { %p964_p10 = pnand %p963_p4, %p957_p9 }
 0x2f5   : > { %967 = shalt.err (!%p964_p10)
}
 0x2f6   : > { %689 = dma.vmem_to_hbm [thread:$0]  (%p1436_p2), %s1359_s26, 128, %s1357_s13, %s476_s4  }
 0x2f7 PF: > { %s501_s30 = sand.u32 1, %s1010_s21   ;;  %p1437_p5 = scmp.ne.s32.totalorder %s1426_s20, 0 }
 0x2f8   : > { %p1438_p7 = scmp.ge.s32.totalorder %s1022_s24, 2  ;;  %s502_s14 = scalar_lea.sflag [#allocation4], %s501_s30 }
 0x2fa   : > { %p712_p8 = pnand %p1438_p7, %p1437_p5 }
 0x2fc   : > { %1005 = dma.done.wait (!%p712_p8), %s502_s14, 128  }
 0x2fd   : > { %1007 = vsyncadd (!%p712_p8), %s502_s14, 4294967168  ;;  %p24_p6 = scmp.ge.s32.totalorder %s1213_s7, 4   ;;  %s1439_s21 = smov %s1014_s22 }
 0x2fe   : > { %s1440_s22 = smov %s1018_s23  ;;  %s1441_s23 = smov %s1224_s16 }
 0x2ff   : > { %s1442_s24 = smov %s1213_s7  ;;  %26 = sbr.rel (!%p24_p6) target bundleno = 13 (0xd), region = 118 }
 0x306   :  { %507 = vsyncpa [#allocation3], 1 }
 0x307   :  { %509 = vsyncpa [#allocation3 + $0x1], 1 }
 0x308   :  { %510 = vsyncpa [#allocation6], 1 }
 0x309   :  { %511 = vsyncpa [#allocation9], 1 }
 0x30a   :  { %513 = vsyncpa [#allocation9 + $0x1], 1 }
 0x30b   :  { %514 = vsyncpa [#allocation12], 1 }
 0x30c   :  { %515 = vsyncpa [#allocation4], 1 }
 0x30d   :  { %517 = vsyncpa [#allocation4 + $0x1], 1 }

</bundles_post_ra>
